<compile_context>
chip_gen: v7x
topology: tpu7x:2x2x1
jax: 0.10.0
libtpu: 0.0.40
codegen_flags: <defaults>
</compile_context>

<pallas_src>
import functools

import jax
import jax.numpy as jnp
from jax.experimental import pallas as pl
from jax.experimental.pallas import tpu as pltpu


def _round_up(x, m):
    return ((x + m - 1) // m) * m


def _mlp_kernel(xxt_scaling, n_hidden,
                seq_ref, selt_ref, vpat_ref, seli_ref, selj_ref, *refs):
    """refs = (W0a, W0b, b0, W1, b1, ..., W_out, b_out, o_ref)."""
    *param_refs, o_ref = refs

    s = seq_ref[...].astype(jnp.float32)                     # (bt, T) token values

    # ---- fused feature construction (2-D ops only: matmul + compare, no reshape/concat) ----
    # one-hot block: s_rep[b, t*V + v] = seq[b, t];  onehot = (s_rep == v)
    s_rep = jnp.dot(s, selt_ref[...], preferred_element_type=jnp.float32)
    onehot = (s_rep == vpat_ref[...]).astype(jnp.bfloat16)   # (bt, T*V), exact 0/1

    # XXT block: xxt[b, i*T + j] = scale * (seq[b, i] == seq[b, j])
    s_i = jnp.dot(s, seli_ref[...], preferred_element_type=jnp.float32)
    s_j = jnp.dot(s, selj_ref[...], preferred_element_type=jnp.float32)
    xxt = ((s_i == s_j).astype(jnp.float32) *
           jnp.float32(xxt_scaling)).astype(jnp.bfloat16)    # (bt, T*T)

    # ---- first hidden layer (W0 split into one-hot / XXT halves; avoids in-kernel concat) ----
    w0a, w0b, b0 = param_refs[0], param_refs[1], param_refs[2]
    h = (jnp.dot(onehot, w0a[...], preferred_element_type=jnp.float32)
         + jnp.dot(xxt, w0b[...], preferred_element_type=jnp.float32)
         + b0[...])
    h = jnp.maximum(h, 0.0)

    # ---- remaining hidden layers (ReLU) ----
    rest = param_refs[3:]
    for i in range(n_hidden - 1):
        w = rest[2 * i][...]
        b = rest[2 * i + 1][...]
        h = jnp.dot(h.astype(jnp.bfloat16), w, preferred_element_type=jnp.float32) + b
        h = jnp.maximum(h, 0.0)

    # ---- output projection (out dim padded to a multiple of 128 -> lane-dense store) ----
    w_out = rest[-2][...]
    b_out = rest[-1][...]
    out = jnp.dot(h.astype(jnp.bfloat16), w_out, preferred_element_type=jnp.float32) + b_out
    o_ref[...] = out.astype(o_ref.dtype)


def template_matching_mlp(seq, params, *, vocab_size, xxt_scaling=1.0, batch_tile=None):
    """seq: (B, T) int32 tokens.  params: flat list [W0, b0, ..., W_out, b_out],
    W: (in, out) f32, b: (1, out) f32 (torch Linear transposed)."""
    B, T = seq.shape
    V = vocab_size
    F_onehot = T * V
    F_xxt = T * T
    assert params[0].shape[0] == F_onehot + F_xxt, "first weight must match feature dim"
    n_hidden = (len(params) - 2) // 2
    assert n_hidden >= 1, "expects at least one hidden (ReLU) layer before the output layer"

    out_dim = params[-1].shape[-1]
    out_pad = _round_up(out_dim, 128)

    # ---- batch tiling: real grid so DMA pipelines and both v7x TCs get work.
    # 512 rows keeps per-tile VMEM modest even against v7x's 64 MiB; tune upward for huge B.
    if batch_tile is None:
        batch_tile = min(512, _round_up(B, 8))
    batch_tile = _round_up(batch_tile, 8)
    Bp = _round_up(B, batch_tile)
    seq_p = seq if Bp == B else jnp.pad(seq, ((0, Bp - B), (0, 0)))

    # ---- constant selection matrices for in-kernel feature construction (built once) ----
    eye_t = jnp.eye(T, dtype=jnp.float32)
    sel_onehot = jnp.kron(eye_t, jnp.ones((1, V), jnp.float32))          # (T, T*V): col t*V+v <- row t
    v_pattern = jnp.tile(jnp.arange(V, dtype=jnp.float32), T)[None, :]   # (1, T*V): value v at col t*V+v
    sel_i = jnp.kron(eye_t, jnp.ones((1, T), jnp.float32))               # (T, T*T): col i*T+j <- row i
    sel_j = jnp.tile(eye_t, (1, T))                                      # (T, T*T): col i*T+j <- row j

    # ---- zero-pad hidden/output dims to multiples of 128 (exactly equivalent), cast W -> bf16 ----
    def pad2(w, rows, cols):
        return jnp.pad(w, ((0, rows - w.shape[0]), (0, cols - w.shape[1])))

    hidden_dims = [params[2 * i].shape[1] for i in range(n_hidden)]
    padded_hidden = [_round_up(h, 128) for h in hidden_dims]

    w0, b0 = params[0], params[1]
    h0p = padded_hidden[0]
    proc_params = [
        pad2(w0[:F_onehot], F_onehot, h0p).astype(jnp.bfloat16),   # W0a
        pad2(w0[F_onehot:], F_xxt, h0p).astype(jnp.bfloat16),      # W0b
        pad2(b0, 1, h0p).astype(jnp.float32),                      # b0
    ]
    prev = h0p
    for i in range(1, n_hidden):
        w, b = params[2 * i], params[2 * i + 1]
        hp = padded_hidden[i]
        proc_params.append(pad2(w, prev, hp).astype(jnp.bfloat16))
        proc_params.append(pad2(b, 1, hp).astype(jnp.float32))
        prev = hp
    proc_params.append(pad2(params[-2], prev, out_pad).astype(jnp.bfloat16))   # W_out
    proc_params.append(pad2(params[-1], 1, out_pad).astype(jnp.float32))       # b_out

    consts = [sel_onehot, v_pattern, sel_i, sel_j]

    in_specs = [pl.BlockSpec((batch_tile, T), lambda i: (i, 0))]
    # Constant-index inputs: block index never changes, so the pipeline DMAs them only once.
    for a in consts + proc_params:
        in_specs.append(pl.BlockSpec(a.shape, lambda i: (0, 0)))
    out_spec = pl.BlockSpec((batch_tile, out_pad), lambda i: (i, 0))

    # ---- advisory cost estimate for XLA scheduling ----
    per_row = 2 * T * F_onehot + 2 * 2 * T * F_xxt          # selection matmuls
    per_row += 2 * (F_onehot + F_xxt) * h0p                  # first layer
    p = h0p
    for i in range(1, n_hidden):
        per_row += 2 * p * padded_hidden[i]
        p = padded_hidden[i]
    per_row += 2 * p * out_pad                               # output layer
    bytes_accessed = (int(seq_p.size) * 4
                      + sum(int(a.size) * a.dtype.itemsize for a in consts + proc_params)
                      + Bp * out_pad * 4)
    cost = pl.CostEstimate(flops=int(Bp * per_row), transcendentals=0,
                           bytes_accessed=int(bytes_accessed))

    kernel = functools.partial(_mlp_kernel, float(xxt_scaling), n_hidden)

    out = pl.pallas_call(
        kernel,
        out_shape=jax.ShapeDtypeStruct((Bp, out_pad), jnp.float32),
        grid_spec=pltpu.PrefetchScalarGridSpec(
            num_scalar_prefetch=0,
            grid=(Bp // batch_tile,),
            in_specs=in_specs,
            out_specs=out_spec,
        ),
        compiler_params=pltpu.CompilerParams(
            dimension_semantics=("parallel",),          # batch tiles shard across v7x's 2 TCs
            vmem_limit_bytes=48 * 1024 * 1024,          # headroom below v7x's 64 MiB physical
        ),
        cost_estimate=cost,
    )(seq_p, *consts, *proc_params)

    return out[:B, :out_dim]


def build_features(seq, vocab_size, xxt_scaling):
    """Pure-JAX feature glue (reference only): one-hot + pairwise-equality, row-major flatten."""
    B, T = seq.shape
    xxt = (seq[:, None, :] == seq[:, :, None]).reshape(B, T * T).astype(jnp.float32) * xxt_scaling
    onehot = jax.nn.one_hot(seq, vocab_size, dtype=jnp.float32).reshape(B, T * vocab_size)
    return jnp.concatenate([onehot, xxt], axis=1)


def reference_forward(seq, params, *, vocab_size, xxt_scaling=1.0):
    """Pure-JAX reference mirroring the kernel's bf16-in / f32-accumulate numerics."""
    x = build_features(seq, vocab_size, xxt_scaling)
    n_hidden = (len(params) - 2) // 2
    for i in range(n_hidden):
        w = params[2 * i].astype(jnp.bfloat16)
        x = jnp.dot(x.astype(jnp.bfloat16), w,
                    preferred_element_type=jnp.float32) + params[2 * i + 1]
        x = jnp.maximum(x, 0.0)
    w = params[-2].astype(jnp.bfloat16)
    return jnp.dot(x.astype(jnp.bfloat16), w,
                   preferred_element_type=jnp.float32) + params[-1]


def init_params(key, dims):
    """Deterministic torch.nn.Linear-style init: U(-1/sqrt(fan_in), 1/sqrt(fan_in))."""
    params = []
    for i in range(len(dims) - 1):
        key, kw, kb = jax.random.split(key, 3)
        bound = 1.0 / (dims[i] ** 0.5)
        W = jax.random.uniform(kw, (dims[i], dims[i + 1]),
                               minval=-bound, maxval=bound, dtype=jnp.float32)
        b = jax.random.uniform(kb, (1, dims[i + 1]),
                               minval=-bound, maxval=bound, dtype=jnp.float32)
        params += [W, b]
    return params


if __name__ == "__main__":
    vocab_size = 8
    template_length = 8
    hidden_dim = 32
    output_dim = 4
    num_layers = 3          # -> 2 hidden (ReLU) linears + 1 output linear
    xxt_scaling = 0.5
    B = 8

    key = jax.random.PRNGKey(0)
    k_seq, k_par = jax.random.split(key)

    seq = jax.random.randint(k_seq, (B, template_length), 0, vocab_size, dtype=jnp.int32)

    input_dim = vocab_size * template_length + template_length ** 2   # 64 + 64 = 128
    dims = [input_dim] + [hidden_dim] * (num_layers - 1) + [output_dim]
    params = init_params(k_par, dims)

    out = template_matching_mlp(seq, params, vocab_size=vocab_size, xxt_scaling=xxt_scaling)
    out = jax.block_until_ready(out)

    ref = reference_forward(seq, params, vocab_size=vocab_size, xxt_scaling=xxt_scaling)
    assert out.shape == (B, output_dim)
    assert jnp.allclose(out, ref, atol=1e-3, rtol=1e-3), "mismatch vs pure-JAX reference"

    print("KERNEL_OK")
</pallas_src>

<mosaic_0001>
module attributes {stable_mosaic.version = 11 : i64} {
  func.func @_mlp_kernel(%arg0: i32, %arg1: memref<8x8xi32, #tpu.memory_space<vmem>>, %arg2: memref<8x64xf32, #tpu.memory_space<vmem>>, %arg3: memref<1x64xf32, #tpu.memory_space<vmem>>, %arg4: memref<8x64xf32, #tpu.memory_space<vmem>>, %arg5: memref<8x64xf32, #tpu.memory_space<vmem>>, %arg6: memref<64x128xbf16, #tpu.memory_space<vmem>>, %arg7: memref<64x128xbf16, #tpu.memory_space<vmem>>, %arg8: memref<1x128xf32, #tpu.memory_space<vmem>>, %arg9: memref<128x128xbf16, #tpu.memory_space<vmem>>, %arg10: memref<1x128xf32, #tpu.memory_space<vmem>>, %arg11: memref<128x128xbf16, #tpu.memory_space<vmem>>, %arg12: memref<1x128xf32, #tpu.memory_space<vmem>>, %arg13: memref<8x128xf32, #tpu.memory_space<vmem>>) attributes {dimension_semantics = [#tpu.dimension_semantics<parallel>], iteration_bounds = array<i64: 1>, scalar_prefetch = 0 : i64, scratch_operands = 0 : i64, tpu.core_type = #tpu.core_type<tc>, window_params = [{transform_indices = @transform_0, window_bounds = array<i64: 8, 8>}, {pipeline_mode = #tpu.pipeline_mode<synchronous>, transform_indices = @transform_1, window_bounds = array<i64: 8, 64>}, {pipeline_mode = #tpu.pipeline_mode<synchronous>, transform_indices = @transform_2, window_bounds = array<i64: 1, 64>}, {pipeline_mode = #tpu.pipeline_mode<synchronous>, transform_indices = @transform_3, window_bounds = array<i64: 8, 64>}, {pipeline_mode = #tpu.pipeline_mode<synchronous>, transform_indices = @transform_4, window_bounds = array<i64: 8, 64>}, {pipeline_mode = #tpu.pipeline_mode<synchronous>, transform_indices = @transform_5, window_bounds = array<i64: 64, 128>}, {pipeline_mode = #tpu.pipeline_mode<synchronous>, transform_indices = @transform_6, window_bounds = array<i64: 64, 128>}, {pipeline_mode = #tpu.pipeline_mode<synchronous>, transform_indices = @transform_7, window_bounds = array<i64: 1, 128>}, {pipeline_mode = #tpu.pipeline_mode<synchronous>, transform_indices = @transform_8, window_bounds = array<i64: 128, 128>}, {pipeline_mode = #tpu.pipeline_mode<synchronous>, transform_indices = @transform_9, window_bounds = array<i64: 1, 128>}, {pipeline_mode = #tpu.pipeline_mode<synchronous>, transform_indices = @transform_10, window_bounds = array<i64: 128, 128>}, {pipeline_mode = #tpu.pipeline_mode<synchronous>, transform_indices = @transform_11, window_bounds = array<i64: 1, 128>}, {transform_indices = @transform_12, window_bounds = array<i64: 8, 128>}]} {
    %c0 = arith.constant 0 : index
    %c0_0 = arith.constant 0 : index
    %0 = vector.load %arg1[%c0, %c0_0] : memref<8x8xi32, #tpu.memory_space<vmem>>, vector<8x8xi32>
    %1 = arith.sitofp %0 : vector<8x8xi32> to vector<8x8xf32>
    %c0_1 = arith.constant 0 : index
    %c0_2 = arith.constant 0 : index
    %2 = vector.load %arg2[%c0_1, %c0_2] : memref<8x64xf32, #tpu.memory_space<vmem>>, vector<8x64xf32>
    %cst = arith.constant dense<0.000000e+00> : vector<8x64xf32>
    %3 = tpu.matmul %1, %2, %cst {dimension_numbers = #tpu.dot_dimension_numbers<[1], [0], [0], [1], [0, 0, 1, 1], [], []>} : vector<8x8xf32>, vector<8x64xf32>, vector<8x64xf32> -> vector<8x64xf32>
    %c0_3 = arith.constant 0 : index
    %c0_4 = arith.constant 0 : index
    %4 = vector.load %arg3[%c0_3, %c0_4] : memref<1x64xf32, #tpu.memory_space<vmem>>, vector<1x64xf32>
    %5 = vector.broadcast %4 : vector<1x64xf32> to vector<8x64xf32>
    %6 = arith.cmpf oeq, %3, %5 : vector<8x64xf32>
    %7 = arith.extui %6 : vector<8x64xi1> to vector<8x64xi32>
    %8 = arith.sitofp %7 : vector<8x64xi32> to vector<8x64xf32>
    %9 = arith.truncf %8 : vector<8x64xf32> to vector<8x64xbf16>
    %c0_5 = arith.constant 0 : index
    %c0_6 = arith.constant 0 : index
    %10 = vector.load %arg4[%c0_5, %c0_6] : memref<8x64xf32, #tpu.memory_space<vmem>>, vector<8x64xf32>
    %cst_7 = arith.constant dense<0.000000e+00> : vector<8x64xf32>
    %11 = tpu.matmul %1, %10, %cst_7 {dimension_numbers = #tpu.dot_dimension_numbers<[1], [0], [0], [1], [0, 0, 1, 1], [], []>} : vector<8x8xf32>, vector<8x64xf32>, vector<8x64xf32> -> vector<8x64xf32>
    %c0_8 = arith.constant 0 : index
    %c0_9 = arith.constant 0 : index
    %12 = vector.load %arg5[%c0_8, %c0_9] : memref<8x64xf32, #tpu.memory_space<vmem>>, vector<8x64xf32>
    %cst_10 = arith.constant dense<0.000000e+00> : vector<8x64xf32>
    %13 = tpu.matmul %1, %12, %cst_10 {dimension_numbers = #tpu.dot_dimension_numbers<[1], [0], [0], [1], [0, 0, 1, 1], [], []>} : vector<8x8xf32>, vector<8x64xf32>, vector<8x64xf32> -> vector<8x64xf32>
    %14 = arith.cmpf oeq, %11, %13 : vector<8x64xf32>
    %15 = arith.extui %14 : vector<8x64xi1> to vector<8x64xi32>
    %16 = arith.sitofp %15 : vector<8x64xi32> to vector<8x64xf32>
    %cst_11 = arith.constant 5.000000e-01 : f32
    %17 = vector.broadcast %cst_11 : f32 to vector<8x64xf32>
    %18 = arith.mulf %16, %17 : vector<8x64xf32>
    %19 = arith.truncf %18 : vector<8x64xf32> to vector<8x64xbf16>
    %c0_12 = arith.constant 0 : index
    %c0_13 = arith.constant 0 : index
    %20 = vector.load %arg6[%c0_12, %c0_13] : memref<64x128xbf16, #tpu.memory_space<vmem>>, vector<64x128xbf16>
    %cst_14 = arith.constant dense<0.000000e+00> : vector<8x128xf32>
    %21 = tpu.matmul %9, %20, %cst_14 {dimension_numbers = #tpu.dot_dimension_numbers<[1], [0], [0], [1], [0, 0, 1, 1], [], []>} : vector<8x64xbf16>, vector<64x128xbf16>, vector<8x128xf32> -> vector<8x128xf32>
    %c0_15 = arith.constant 0 : index
    %c0_16 = arith.constant 0 : index
    %22 = vector.load %arg7[%c0_15, %c0_16] : memref<64x128xbf16, #tpu.memory_space<vmem>>, vector<64x128xbf16>
    %cst_17 = arith.constant dense<0.000000e+00> : vector<8x128xf32>
    %23 = tpu.matmul %19, %22, %cst_17 {dimension_numbers = #tpu.dot_dimension_numbers<[1], [0], [0], [1], [0, 0, 1, 1], [], []>} : vector<8x64xbf16>, vector<64x128xbf16>, vector<8x128xf32> -> vector<8x128xf32>
    %24 = arith.addf %21, %23 : vector<8x128xf32>
    %c0_18 = arith.constant 0 : index
    %c0_19 = arith.constant 0 : index
    %25 = vector.load %arg8[%c0_18, %c0_19] : memref<1x128xf32, #tpu.memory_space<vmem>>, vector<1x128xf32>
    %26 = vector.broadcast %25 : vector<1x128xf32> to vector<8x128xf32>
    %27 = arith.addf %24, %26 : vector<8x128xf32>
    %cst_20 = arith.constant 0.000000e+00 : f32
    %28 = vector.broadcast %cst_20 : f32 to vector<8x128xf32>
    %29 = arith.maximumf %27, %28 : vector<8x128xf32>
    %c0_21 = arith.constant 0 : index
    %c0_22 = arith.constant 0 : index
    %30 = vector.load %arg9[%c0_21, %c0_22] : memref<128x128xbf16, #tpu.memory_space<vmem>>, vector<128x128xbf16>
    %c0_23 = arith.constant 0 : index
    %c0_24 = arith.constant 0 : index
    %31 = vector.load %arg10[%c0_23, %c0_24] : memref<1x128xf32, #tpu.memory_space<vmem>>, vector<1x128xf32>
    %32 = arith.truncf %29 : vector<8x128xf32> to vector<8x128xbf16>
    %cst_25 = arith.constant dense<0.000000e+00> : vector<8x128xf32>
    %33 = tpu.matmul %32, %30, %cst_25 {dimension_numbers = #tpu.dot_dimension_numbers<[1], [0], [0], [1], [0, 0, 1, 1], [], []>} : vector<8x128xbf16>, vector<128x128xbf16>, vector<8x128xf32> -> vector<8x128xf32>
    %34 = vector.broadcast %31 : vector<1x128xf32> to vector<8x128xf32>
    %35 = arith.addf %33, %34 : vector<8x128xf32>
    %cst_26 = arith.constant 0.000000e+00 : f32
    %36 = vector.broadcast %cst_26 : f32 to vector<8x128xf32>
    %37 = arith.maximumf %35, %36 : vector<8x128xf32>
    %c0_27 = arith.constant 0 : index
    %c0_28 = arith.constant 0 : index
    %38 = vector.load %arg11[%c0_27, %c0_28] : memref<128x128xbf16, #tpu.memory_space<vmem>>, vector<128x128xbf16>
    %c0_29 = arith.constant 0 : index
    %c0_30 = arith.constant 0 : index
    %39 = vector.load %arg12[%c0_29, %c0_30] : memref<1x128xf32, #tpu.memory_space<vmem>>, vector<1x128xf32>
    %40 = arith.truncf %37 : vector<8x128xf32> to vector<8x128xbf16>
    %cst_31 = arith.constant dense<0.000000e+00> : vector<8x128xf32>
    %41 = tpu.matmul %40, %38, %cst_31 {dimension_numbers = #tpu.dot_dimension_numbers<[1], [0], [0], [1], [0, 0, 1, 1], [], []>} : vector<8x128xbf16>, vector<128x128xbf16>, vector<8x128xf32> -> vector<8x128xf32>
    %42 = vector.broadcast %39 : vector<1x128xf32> to vector<8x128xf32>
    %43 = arith.addf %41, %42 : vector<8x128xf32>
    %c0_32 = arith.constant 0 : index
    %c0_33 = arith.constant 0 : index
    %44 = vector.load %arg13[%c0_32, %c0_33] : memref<8x128xf32, #tpu.memory_space<vmem>>, vector<8x128xf32>
    tpu.vector_store %arg13[%c0_32, %c0_33], %43 {strides = array<i32>} : memref<8x128xf32, #tpu.memory_space<vmem>>, vector<8x128xf32>,
    return
  }
  func.func @transform_0(%arg0: i32) -> (i32, i32) {
    %c0_i32 = arith.constant 0 : i32
    %c0_i32_0 = arith.constant 0 : i32
    return %arg0, %c0_i32 : i32, i32
  }
  func.func @transform_1(%arg0: i32) -> (i32, i32) {
    %c0_i32 = arith.constant 0 : i32
    %c0_i32_0 = arith.constant 0 : i32
    %c0_i32_1 = arith.constant 0 : i32
    return %c0_i32, %c0_i32_0 : i32, i32
  }
  func.func @transform_2(%arg0: i32) -> (i32, i32) {
    %c0_i32 = arith.constant 0 : i32
    %c0_i32_0 = arith.constant 0 : i32
    %c0_i32_1 = arith.constant 0 : i32
    return %c0_i32, %c0_i32_0 : i32, i32
  }
  func.func @transform_3(%arg0: i32) -> (i32, i32) {
    %c0_i32 = arith.constant 0 : i32
    %c0_i32_0 = arith.constant 0 : i32
    %c0_i32_1 = arith.constant 0 : i32
    return %c0_i32, %c0_i32_0 : i32, i32
  }
  func.func @transform_4(%arg0: i32) -> (i32, i32) {
    %c0_i32 = arith.constant 0 : i32
    %c0_i32_0 = arith.constant 0 : i32
    %c0_i32_1 = arith.constant 0 : i32
    return %c0_i32, %c0_i32_0 : i32, i32
  }
  func.func @transform_5(%arg0: i32) -> (i32, i32) {
    %c0_i32 = arith.constant 0 : i32
    %c0_i32_0 = arith.constant 0 : i32
    %c0_i32_1 = arith.constant 0 : i32
    return %c0_i32, %c0_i32_0 : i32, i32
  }
  func.func @transform_6(%arg0: i32) -> (i32, i32) {
    %c0_i32 = arith.constant 0 : i32
    %c0_i32_0 = arith.constant 0 : i32
    %c0_i32_1 = arith.constant 0 : i32
    return %c0_i32, %c0_i32_0 : i32, i32
  }
  func.func @transform_7(%arg0: i32) -> (i32, i32) {
    %c0_i32 = arith.constant 0 : i32
    %c0_i32_0 = arith.constant 0 : i32
    %c0_i32_1 = arith.constant 0 : i32
    return %c0_i32, %c0_i32_0 : i32, i32
  }
  func.func @transform_8(%arg0: i32) -> (i32, i32) {
    %c0_i32 = arith.constant 0 : i32
    %c0_i32_0 = arith.constant 0 : i32
    %c0_i32_1 = arith.constant 0 : i32
    return %c0_i32, %c0_i32_0 : i32, i32
  }
  func.func @transform_9(%arg0: i32) -> (i32, i32) {
    %c0_i32 = arith.constant 0 : i32
    %c0_i32_0 = arith.constant 0 : i32
    %c0_i32_1 = arith.constant 0 : i32
    return %c0_i32, %c0_i32_0 : i32, i32
  }
  func.func @transform_10(%arg0: i32) -> (i32, i32) {
    %c0_i32 = arith.constant 0 : i32
    %c0_i32_0 = arith.constant 0 : i32
    %c0_i32_1 = arith.constant 0 : i32
    return %c0_i32, %c0_i32_0 : i32, i32
  }
  func.func @transform_11(%arg0: i32) -> (i32, i32) {
    %c0_i32 = arith.constant 0 : i32
    %c0_i32_0 = arith.constant 0 : i32
    %c0_i32_1 = arith.constant 0 : i32
    return %c0_i32, %c0_i32_0 : i32, i32
  }
  func.func @transform_12(%arg0: i32) -> (i32, i32) {
    %c0_i32 = arith.constant 0 : i32
    %c0_i32_0 = arith.constant 0 : i32
    return %arg0, %c0_i32 : i32, i32
  }
}

</mosaic_0001>

<bundles_post_ra>
// kernel: tpu_custom_call.1
= control target key start
LH: loop header
LB: loop body
LE: loop exit
PB: predicated region body
PF: predicated region fallthrough
CT: control target
= control target key end

     0   :  { %17 = vsyncpa [#allocation3], 0  ;;  %s1401_s0 = inlined_call_operand.hbm [shape: s32[8,8], index: 0, kind: input, shape index: {}]   ;;  %s1402_s1 = inlined_call_operand.hbm [shape: f32[8,64], index: 1, kind: input, shape index: {}]   ;;  %s1403_s2 = inlined_call_operand.vmem [shape: f32[1,64], index: 2, kind: input, shape index: {}]   ;;  %s1404_s3 = inlined_call_operand.vmem [shape: f32[8,64], index: 3, kind: input, shape index: {}]   ;;  %s1405_s4 = inlined_call_operand.hbm [shape: f32[8,64], index: 4, kind: input, shape index: {}]   ;;  %s1406_s5 = inlined_call_operand.hbm [shape: bf16[64,128], index: 5, kind: input, shape index: {}]   ;;  %s1407_s6 = inlined_call_operand.hbm [shape: bf16[64,128], index: 6, kind: input, shape index: {}]   ;;  %s1408_s7 = inlined_call_operand.vmem [shape: f32[1,128], index: 7, kind: input, shape index: {}]   ;;  %s1409_s8 = inlined_call_operand.hbm [shape: bf16[128,128], index: 8, kind: input, shape index: {}]   ;;  %s1410_s9 = inlined_call_operand.vmem [shape: f32[1,128], index: 9, kind: input, shape index: {}]   ;;  %s1411_s10 = inlined_call_operand.hbm [shape: bf16[128,128], index: 10, kind: input, shape index: {}]   ;;  %s1412_s11 = inlined_call_operand.vmem [shape: f32[1,128], index: 11, kind: input, shape index: {}]   ;;  %s1413_s12 = inlined_call_operand.hbm [shape: f32[8,128], index: 12, kind: output, shape index: {}]  }
   0x1   :  { %18 = vsyncpa [#allocation6], 0 }
   0x2   :  { %19 = vsyncpa [#allocation9], 0 }
   0x3   :  { %20 = vsyncpa [#allocation12], 0 }
   0x4   :  { %21 = vsyncpa [#allocation4], 0  ;;  %s1141_s21 = smov [#allocation5]   ;;  %s1142_s23 = smov [#allocation8]  }
   0x5   :  { %s38_s22 = sshll.u32 %s1141_s21, 4  ;;  %s61_s24 = sshll.u32 %s1142_s23, 4  ;;  %s39_s22 = int_to_ptr.vmem [resolvable:$true] %s38_s22  ;;  %s1218_s24 = int_to_ptr.vmem [resolvable:$true] %s61_s24 }
   0x6   :  { %s955_s27 = scalar_lea.hbm %s1402_s1, 128 }
   0x7   :  { %p956_p0 = scmp.ne.s32.totalorder %s1402_s1, %s955_s27  ;;  %p959_p1 = scmp.lt.u32.totalorder %s955_s27, %s1402_s1 }
   0x9   :  { %p961_p2 = pnand %p959_p1, %p956_p0 }
   0xb   :  { %964 = shalt.err (!%p961_p2)
}
   0xc   :  { %s965_s14 = scalar_lea.vmem %s39_s22, 128  ;;  %p970_p4 = scmp.lt.s32.totalorder %s39_s22, %s39_s22 }
   0xd   :  { %p966_p3 = scmp.ne.s32.totalorder %s39_s22, %s965_s14  ;;  %p971_p5 = scmp.lt.s32.totalorder %s965_s14, %s965_s14 }
   0xf   :  { %p972_p6 = por %p971_p5, %p970_p4 }
  0x11   :  { %p973_p7 = pnand %p972_p6, %p966_p3 }
  0x13   :  { %976 = shalt.err (!%p973_p7)
}
  0x14   :  { %41 = dma.hbm_to_vmem [thread:$0]  %s1402_s1, 128, %s39_s22, [#allocation6]  }
  0x15   :  { %s977_s19 = scalar_lea.hbm %s1406_s5, 512 }
  0x16   :  { %p978_p8 = scmp.ne.s32.totalorder %s1406_s5, %s977_s19  ;;  %p981_p9 = scmp.lt.u32.totalorder %s977_s19, %s1406_s5 }
  0x18   :  { %p983_p10 = pnand %p981_p9, %p978_p8 }
  0x1a   :  { %986 = shalt.err (!%p983_p10)
}
  0x1b   :  { %s987_s26 = scalar_lea.vmem %s1218_s24, 512  ;;  %p992_p12 = scmp.lt.s32.totalorder %s1218_s24, %s1218_s24 }
  0x1c   :  { %p988_p11 = scmp.ne.s32.totalorder %s1218_s24, %s987_s26  ;;  %p993_p13 = scmp.lt.s32.totalorder %s987_s26, %s987_s26 }
  0x1e   :  { %p994_p0 = por %p993_p13, %p992_p12 }
  0x20   :  { %p995_p1 = pnand %p994_p0, %p988_p11 }
  0x22   :  { %998 = shalt.err (!%p995_p1)
}
  0x23   :  { %s1143_s1 = smov 64   ;;  %s1144_s22 = smov 4  }
  0x24   :  { %67 = dma.hbm_to_vmem [thread:$0]  %s1406_s5, 512, %s1218_s24, [#allocation9], %s1143_s1, %s1143_s1, %s1144_s22  }
  0x25   :  { %s1145_s29 = smov [#allocation11]   ;;  %s1146_s13 = smov [#allocation2]  }
  0x26   :  { %s87_s30 = sshll.u32 %s1145_s29, 4  ;;  %s28_s14 = sshll.u32 %s1146_s13, 4  ;;  %s88_s30 = int_to_ptr.vmem [resolvable:$true] %s87_s30  ;;  %s29_s14 = int_to_ptr.vmem [resolvable:$true] %s28_s14 }
  0x27   :  { %s999_s17 = scalar_lea.hbm %s1409_s8, 1024 }
  0x28   :  { %p1000_p2 = scmp.ne.s32.totalorder %s1409_s8, %s999_s17  ;;  %p1003_p3 = scmp.lt.u32.totalorder %s999_s17, %s1409_s8 }
  0x2a   :  { %p1005_p4 = pnand %p1003_p3, %p1000_p2 }
  0x2c   :  { %1008 = shalt.err (!%p1005_p4)
}
  0x2d   :  { %s1009_s5 = scalar_lea.vmem %s88_s30, 1024  ;;  %p1014_p6 = scmp.lt.s32.totalorder %s88_s30, %s88_s30 }
  0x2e   :  { %p1010_p5 = scmp.ne.s32.totalorder %s88_s30, %s1009_s5  ;;  %p1015_p7 = scmp.lt.s32.totalorder %s1009_s5, %s1009_s5 }
  0x30   :  { %p1016_p8 = por %p1015_p7, %p1014_p6 }
  0x32   :  { %p1017_p9 = pnand %p1016_p8, %p1010_p5 }
  0x34   :  { %1020 = shalt.err (!%p1017_p9)
}
  0x35   :  { %93 = dma.hbm_to_vmem [thread:$0]  %s1409_s8, 1024, %s88_s30, [#allocation12], %s1143_s1, %s1143_s1, %s1144_s22  }
  0x36   :  { %s1021_s27 = scalar_lea.hbm %s1401_s0, 128 }
  0x37   :  { %p1022_p10 = scmp.ne.s32.totalorder %s1401_s0, %s1021_s27  ;;  %p1025_p11 = scmp.lt.u32.totalorder %s1021_s27, %s1401_s0 }
  0x39   :  { %p1027_p12 = pnand %p1025_p11, %p1022_p10 }
  0x3b   :  { %1030 = shalt.err (!%p1027_p12)
}
  0x3c   :  { %s1031_s16 = scalar_lea.vmem %s29_s14, 128  ;;  %p1036_p0 = scmp.lt.s32.totalorder %s29_s14, %s29_s14 }
  0x3d   :  { %p1032_p13 = scmp.ne.s32.totalorder %s29_s14, %s1031_s16  ;;  %p1037_p1 = scmp.lt.s32.totalorder %s1031_s16, %s1031_s16 }
  0x3f   :  { %p1038_p2 = por %p1037_p1, %p1036_p0 }
  0x41   :  { %p1039_p3 = pnand %p1038_p2, %p1032_p13 }
  0x43   :  { %1042 = shalt.err (!%p1039_p3)
}
  0x44   :  { %31 = dma.hbm_to_vmem [thread:$0]  %s1401_s0, 128, %s29_s14, [#allocation3]  }
  0x45   :  { %s1147_s17 = smov [#allocation7]   ;;  %s1148_s19 = smov [#allocation10]  }
  0x46   :  { %s52_s18 = sshll.u32 %s1147_s17, 4  ;;  %s73_s20 = sshll.u32 %s1148_s19, 4  ;;  %s53_s18 = int_to_ptr.vmem [resolvable:$true] %s52_s18  ;;  %s1279_s20 = int_to_ptr.vmem [resolvable:$true] %s73_s20 }
  0x47   :  { %s1043_s24 = scalar_lea.hbm %s1405_s4, 128 }
  0x48   :  { %p1044_p4 = scmp.ne.s32.totalorder %s1405_s4, %s1043_s24  ;;  %p1047_p5 = scmp.lt.u32.totalorder %s1043_s24, %s1405_s4 }
  0x4a   :  { %p1049_p6 = pnand %p1047_p5, %p1044_p4 }
  0x4c   :  { %1052 = shalt.err (!%p1049_p6)
}
  0x4d   :  { %s1053_s0 = scalar_lea.vmem %s53_s18, 128  ;;  %p1058_p8 = scmp.lt.s32.totalorder %s53_s18, %s53_s18 }
  0x4e   :  { %p1054_p7 = scmp.ne.s32.totalorder %s53_s18, %s1053_s0  ;;  %p1059_p9 = scmp.lt.s32.totalorder %s1053_s0, %s1053_s0 }
  0x50   :  { %p1060_p10 = por %p1059_p9, %p1058_p8 }
  0x52   :  { %p1061_p11 = pnand %p1060_p10, %p1054_p7 }
  0x54   :  { %1064 = shalt.err (!%p1061_p11)
}
  0x55   :  { %55 = dma.hbm_to_vmem [thread:$0]  %s1405_s4, 128, %s53_s18, [#allocation6]  }
  0x56   :  { %s1065_s15 = scalar_lea.hbm %s1407_s6, 512 }
  0x57   :  { %p1066_p12 = scmp.ne.s32.totalorder %s1407_s6, %s1065_s15  ;;  %p1069_p13 = scmp.lt.u32.totalorder %s1065_s15, %s1407_s6 }
  0x59   :  { %p1071_p0 = pnand %p1069_p13, %p1066_p12 }
  0x5b   :  { %1074 = shalt.err (!%p1071_p0)
}
  0x5c   :  { %s1075_s19 = scalar_lea.vmem %s1279_s20, 512  ;;  %p1080_p2 = scmp.lt.s32.totalorder %s1279_s20, %s1279_s20 }
  0x5d   :  { %p1076_p1 = scmp.ne.s32.totalorder %s1279_s20, %s1075_s19  ;;  %p1081_p3 = scmp.lt.s32.totalorder %s1075_s19, %s1075_s19 }
  0x5f   :  { %p1082_p4 = por %p1081_p3, %p1080_p2 }
  0x61   :  { %p1083_p5 = pnand %p1082_p4, %p1076_p1 }
  0x63   :  { %1086 = shalt.err (!%p1083_p5)
}
  0x64   :  { %79 = dma.hbm_to_vmem [thread:$0]  %s1407_s6, 512, %s1279_s20, [#allocation9], %s1143_s1, %s1143_s1, %s1144_s22  }
  0x65   :  { %s1149_s21 = smov [#allocation13]   ;;  %s1087_s25 = scalar_lea.hbm %s1411_s10, 1024 }
  0x66   :  { %s101_s5 = sshll.u32 %s1149_s21, 4  ;;  %p1088_p6 = scmp.ne.s32.totalorder %s1411_s10, %s1087_s25  ;;  %s102_s5 = int_to_ptr.vmem [resolvable:$true] %s101_s5 }
  0x67   :  { %p1091_p7 = scmp.lt.u32.totalorder %s1087_s25, %s1411_s10 }
  0x69   :  { %p1093_p8 = pnand %p1091_p7, %p1088_p6 }
  0x6b   :  { %1096 = shalt.err (!%p1093_p8)
}
  0x6c   :  { %s1097_s28 = scalar_lea.vmem %s102_s5, 1024  ;;  %p1102_p10 = scmp.lt.s32.totalorder %s102_s5, %s102_s5 }
  0x6d   :  { %p1098_p9 = scmp.ne.s32.totalorder %s102_s5, %s1097_s28  ;;  %p1103_p11 = scmp.lt.s32.totalorder %s1097_s28, %s1097_s28 }
  0x6f   :  { %p1104_p12 = por %p1103_p11, %p1102_p10 }
  0x71   :  { %p1105_p13 = pnand %p1104_p12, %p1098_p9 }
  0x73   :  { %1108 = shalt.err (!%p1105_p13)
}
  0x74   :  { %107 = dma.hbm_to_vmem [thread:$0]  %s1411_s10, 1024, %s102_s5, [#allocation12], %s1143_s1, %s1143_s1, %s1144_s22  }
  0x75   :  { %1131 = dma.done.wait [#allocation3], 128  }
  0x76   :  { %1132 = vsyncadd [#allocation3], 4294967168 }
  0x77   :  { %1133 = dma.done.wait [#allocation6], 256  }
  0x78   :  { %1134 = vsyncadd [#allocation6], 4294967040 }
  0x79   :  { %1135 = dma.done.wait [#allocation9], 1024  }
  0x7a   :  { %1136 = vsyncadd [#allocation9], 4294966272 }
  0x7b   :  { %1137 = dma.done.wait [#allocation12], 2048  }
  0x7c   :  { %1138 = vsyncadd [#allocation12], 4294965248  ;;  %v1150_v0 = vmov 0.0   ;;  %vm1151_vm0 = vmmov 0   ;;  %v134_v1 = vld [vmem:[#allocation5] sm:$0xff]  ;;  %v132_v2 = vld [vmem:[#allocation2] sm:$0xff] }
  0x7d   :  { %840 = vmatprep.subr.mxu0 %v1150_v0  ;;  %842 = vmatprep.mubr.msk.f32.mxu0 %vm1151_vm0, %v1150_v0  ;;  %vm135_vm1 = vcmask 64512   ;;  %v291_v3 = vld [vmem:[#allocation7] sm:$0xff]  ;;  %v133_v4 = vcvt.s32.f32 %v132_v2  ;;  %v220_v5 = vld [vmem:[%s1404_s3] sm:$0xff]  ;;  %v931_v6 = vld [vmem:[#allocation8] sm:$0xff]   ;;  %vm407_vm3 = vcmask 523264   ;;  %s1152_s8 = smov [#allocation14]  }
  0x7e   :  { %845 = vmatprep.subr.mxu1 %v1150_v0  ;;  %847 = vmatprep.mubr.msk.f32.mxu1 %vm1151_vm0, %v1150_v0  ;;  %v933_v7 = vld [vmem:[#allocation10] sm:$0xff]   ;;  %v932_v8 = vld [vmem:[#allocation8 + $0x8] sm:$0xff]   ;;  %v934_v9 = vld [vmem:[#allocation8 + $0x10] sm:$0xff]   ;;  %s759_s30 = sshll.u32 %s1152_s8, 4  ;;  %s760_s30 = int_to_ptr.vmem [resolvable:$true] %s759_s30 }
  0x7f   :  { %841 = vmatpush3.msra.mxu0 %v134_v1  ;;  %846 = vmatpush3.msra.mxu1 %v220_v5  ;;  %v935_v10 = vld [vmem:[#allocation10 + $0x8] sm:$0xff]   ;;  %v936_v11 = vld [vmem:[#allocation8 + $0x18] sm:$0xff]   ;;  %v937_v12 = vld [vmem:[#allocation10 + $0x10] sm:$0xff]   ;;  %p1114_p1 = scmp.lt.s32.totalorder %s760_s30, %s760_s30 }
  0x80   :  { %850 = vmatprep.subr.mxu0 %v1150_v0  ;;  %843 = vmatmul.mubr.msk.f32.vlgmr.msra.gmra.mrb[0].mxu0 %vm135_vm1, %v133_v4  ;;  %v938_v13 = vld [vmem:[#allocation10 + $0x18] sm:$0xff]   ;;  %v772_v14 = vld [vmem:[%s1403_s2] ss:$0 sm:$0xff]  ;;  %v939_v25 = vld [vmem:[#allocation11] sm:$0xff]  }
  0x81   :  { %848 = vmatmul.mubr.msk.f32.vlgmr.msra.gmra.mrb[0].mxu1 %vm135_vm1, %v133_v4  ;;  %851 = vmatpush3.msra.mxu0 %v291_v3  ;;  %v940_v27 = vld [vmem:[#allocation11 + $0x8] sm:$0xff]   ;;  %v941_v28 = vld [vmem:[#allocation11 + $0x10] sm:$0xff]   ;;  %v942_v29 = vld [vmem:[#allocation11 + $0x18] sm:$0xff]  }
  0x82   :  { %852 = vmatprep.mubr.msk.f32.mxu0 %vm1151_vm0, %v1150_v0  ;;  %867 = vmatprep.subr.bf16.mxu0 %v1150_v0  ;;  %v943_v30 = vld [vmem:[#allocation11 + $0x20] sm:$0xff]   ;;  %v944_v31 = vld [vmem:[#allocation11 + $0x28] sm:$0xff]   ;;  %v945_v32 = vld [vmem:[#allocation11 + $0x30] sm:$0xff]  }
  0x83   :  { %855 = vmatprep.subr.bf16.mxu1 %v1150_v0  ;;  %863 = vmatprep.mubr.msk.bf16.mxu1 %vm1151_vm0, %v1150_v0  ;;  %v946_v33 = vld [vmem:[#allocation11 + $0x38] sm:$0xff]   ;;  %v947_v34 = vld [vmem:[#allocation13] sm:$0xff]   ;;  %v948_v35 = vld [vmem:[#allocation13 + $0x8] sm:$0xff]  }
  0x84   :  { %856 = vmatpush3.bf16.msra.mxu1 %v933_v7  ;;  %853 = vmatmul.mubr.msk.f32.vlgmr.msra.gmra.mrb[2].mxu0 %vm135_vm1, %v133_v4  ;;  %v949_v36 = vld [vmem:[#allocation13 + $0x10] sm:$0xff]   ;;  %v950_v37 = vld [vmem:[#allocation13 + $0x18] sm:$0xff]   ;;  %v951_v38 = vld [vmem:[#allocation13 + $0x20] sm:$0xff]  }
  0x85   :  { %857 = vmatprep.subr.bf16.mxu1 %v1150_v0  ;;  %868 = vmatpush3.bf16.msra.mxu0 %v931_v6  ;;  %v952_v39 = vld [vmem:[#allocation13 + $0x28] sm:$0xff]   ;;  %v953_v53 = vld [vmem:[#allocation13 + $0x30] sm:$0xff]   ;;  %v954_v54 = vld [vmem:[#allocation13 + $0x38] sm:$0xff]  }
  0x86   :  { %875 = vmatprep.mubr.msk.bf16.mxu0 %vm1151_vm0, %v1150_v0  ;;  %869 = vmatprep.subr.bf16.mxu0 %v1150_v0  ;;  %v787_v45 = vld [vmem:[%s1408_s7] ss:$0 sm:$0xff] }
  0x87   :  { %v788_v55 = vld [vmem:[%s1410_s9] ss:$0 sm:$0xff]  ;;  %s1109_s9 = scalar_lea.vmem %s760_s30, 128 }
  0x88   :  { %858 = vmatpush3.bf16.msra.mxu1 %v935_v10  ;;  %v797_v63 = vld [vmem:[%s1412_s11] ss:$0 sm:$0xff]  ;;  %p1110_p0 = scmp.ne.s32.totalorder %s760_s30, %s1109_s9  ;;  %p1115_p2 = scmp.lt.s32.totalorder %s1109_s9, %s1109_s9 }
  0x89   :  { %870 = vmatpush3.bf16.msra.mxu0 %v932_v8  ;;  %859 = vmatprep.subr.bf16.mxu1 %v1150_v0 }
  0x8a   :  { %871 = vmatprep.subr.bf16.mxu0 %v1150_v0  ;;  %p1116_p3 = por %p1115_p2, %p1114_p1 }
  0x8c   :  { %860 = vmatpush3.bf16.msra.mxu1 %v937_v12  ;;  %p1117_p4 = pnand %p1116_p3, %p1110_p0 }
  0x8d   :  { %872 = vmatpush3.bf16.msra.mxu0 %v934_v9  ;;  %861 = vmatprep.subr.bf16.mxu1 %v1150_v0 }
  0x8e   :  { %873 = vmatprep.subr.bf16.mxu0 %v1150_v0 }
  0x90   :  { %862 = vmatpush3.bf16.msra.mxu1 %v938_v13 }
  0x91   :  { %874 = vmatpush3.bf16.msra.mxu0 %v936_v11  ;;  %879 = vmatprep.subr.bf16.mxu1 %v1150_v0 }
  0x92   :  { %899 = vmatprep.subr.bf16.mxu0 %v1150_v0 }
 0x153   :  { %v205_v15 = vpop.f32.mrb[0].mxu0 }
 0x154   :  { %v287_v16 = vpop.f32.mrb[0].mxu1  ;;  %vm216_vm2 = vcmp.eq.f32.partialorder %v205_v15, %v772_v14  ;;  %v844_v17 = vpop.f32.mrb[1].mxu0 }
 0x155   :  { %v849_v18 = vpop.f32.mrb[1].mxu1  ;;  %v773_v19 = vsel %vm216_vm2, 1.0, %v1150_v0 }
 0x156   :  { %v219_v20 = vpack.c.bf16 %v773_v19, %v773_v19 }
 0x157   :  { %v358_v21 = vpop.f32.mrb[2].mxu0 }
 0x158   :  { %vm362_vm4 = vcmp.eq.f32.partialorder %v287_v16, %v358_v21  ;;  %v854_v22 = vpop.f32.mrb[3].mxu0  ;;  %876 = vmatmul.mubr.msk.bf16.vlgmr.msra.gmra.mrb[4].mxu0 %vm407_vm3, %v219_v20 }
 0x159   :  { %v776_v23 = vsel %vm362_vm4, 1.0, %v1150_v0  ;;  %915 = vmatprep.mubr.msk.bf16.mxu0 %vm1151_vm0, %v1150_v0  ;;  %900 = vmatpush3.bf16.msra.mxu0 %v947_v34 }
 0x15a   :  { %v365_v24 = vmul.f32 0.5, %v776_v23  ;;  %901 = vmatprep.subr.bf16.mxu0 %v1150_v0 }
 0x15c   :  { %v366_v26 = vpack.c.bf16 %v365_v24, %v365_v24 }
 0x15d   :  { %902 = vmatpush3.bf16.msra.mxu0 %v948_v35 }
 0x15e   :  { %864 = vmatmul.mubr.msk.bf16.vlgmr.msra.gmra.mrb[4].mxu1 %vm407_vm3, %v366_v26  ;;  %903 = vmatprep.subr.bf16.mxu0 %v1150_v0 }
 0x15f   :  { %880 = vmatpush3.bf16.msra.mxu1 %v939_v25  ;;  %895 = vmatprep.mubr.msk.bf16.mxu1 %vm1151_vm0, %v1150_v0 }
 0x160   :  { %881 = vmatprep.subr.bf16.mxu1 %v1150_v0 }
 0x161   :  { %904 = vmatpush3.bf16.msra.mxu0 %v949_v36 }
 0x162   :  { %905 = vmatprep.subr.bf16.mxu0 %v1150_v0 }
 0x163   :  { %882 = vmatpush3.bf16.msra.mxu1 %v940_v27 }
 0x164   :  { %883 = vmatprep.subr.bf16.mxu1 %v1150_v0 }
 0x165   :  { %906 = vmatpush3.bf16.msra.mxu0 %v950_v37 }
 0x166   :  { %907 = vmatprep.subr.bf16.mxu0 %v1150_v0 }
 0x167   :  { %884 = vmatpush3.bf16.msra.mxu1 %v941_v28 }
 0x168   :  { %885 = vmatprep.subr.bf16.mxu1 %v1150_v0 }
 0x169   :  { %908 = vmatpush3.bf16.msra.mxu0 %v951_v38 }
 0x16a   :  { %909 = vmatprep.subr.bf16.mxu0 %v1150_v0 }
 0x16b   :  { %886 = vmatpush3.bf16.msra.mxu1 %v942_v29 }
 0x16c   :  { %887 = vmatprep.subr.bf16.mxu1 %v1150_v0 }
 0x16d   :  { %910 = vmatpush3.bf16.msra.mxu0 %v952_v39 }
 0x16e   :  { %911 = vmatprep.subr.bf16.mxu0 %v1150_v0 }
 0x16f   :  { %888 = vmatpush3.bf16.msra.mxu1 %v943_v30 }
 0x170   :  { %889 = vmatprep.subr.bf16.mxu1 %v1150_v0 }
 0x171   :  { %912 = vmatpush3.bf16.msra.mxu0 %v953_v53 }
 0x172   :  { %913 = vmatprep.subr.bf16.mxu0 %v1150_v0 }
 0x173   :  { %890 = vmatpush3.bf16.msra.mxu1 %v944_v31 }
 0x174   :  { %891 = vmatprep.subr.bf16.mxu1 %v1150_v0 }
 0x175   :  { %914 = vmatpush3.bf16.msra.mxu0 %v954_v54 }
 0x177   :  { %892 = vmatpush3.bf16.msra.mxu1 %v945_v32 }
 0x178   :  { %893 = vmatprep.subr.bf16.mxu1 %v1150_v0 }
 0x17b   :  { %894 = vmatpush3.bf16.msra.mxu1 %v946_v33 }
 0x22b   :  { %v512_v40 = vpop.f32.mrb[4].mxu0 }
 0x22c   :  { %v877_v41 = vpop.f32.mrb[5].mxu0 }
 0x22d   :  { %v515_v42 = vpop.f32.mrb[6].mxu0 }
 0x22e   :  { %v878_v43 = vpop.f32.mrb[7].mxu0 }
 0x231   :  { %v445_v44 = vpop.f32.mrb[4].mxu1 }
 0x232   :  { %v513_v46 = vadd.f32 %v512_v40, %v445_v44  ;;  %v865_v47 = vpop.f32.mrb[5].mxu1 }
 0x233   :  { %v448_v48 = vpop.f32.mrb[6].mxu1 }
 0x234   :  { %v525_v49 = vadd.f32 %v787_v45, %v513_v46  ;;  %v866_v50 = vpop.f32.mrb[7].mxu1 }
 0x236   :  { %v526_v51 = vmax.f32 %v525_v49, 0.0 }
 0x238   :  { %v544_v52 = vpack.c.bf16 %v526_v51, %v526_v51 }
 0x23a   :  { %896 = vmatmul.mubr.bf16.vlgmr.msra.gmra.mrb[8].mxu1 %v544_v52 }
 0x30d   :  { %v633_v56 = vpop.f32.mrb[8].mxu1 }
 0x30e   :  { %v634_v57 = vadd.f32 %v788_v55, %v633_v56  ;;  %v897_v58 = vpop.f32.mrb[9].mxu1 }
 0x30f   :  { %v636_v59 = vpop.f32.mrb[10].mxu1 }
 0x310   :  { %v639_v60 = vmax.f32 %v634_v57, 0.0  ;;  %v898_v61 = vpop.f32.mrb[11].mxu1 }
 0x312   :  { %v657_v62 = vpack.c.bf16 %v639_v60, %v639_v60 }
 0x314   :  { %916 = vmatmul.mubr.bf16.vlgmr.msra.gmra.mrb[8].mxu0 %v657_v62 }
 0x3e7   :  { %v746_v0 = vpop.f32.mrb[8].mxu0 }
 0x3e8   :  { %v747_v1 = vadd.f32 %v797_v63, %v746_v0  ;;  %v917_v2 = vpop.f32.mrb[9].mxu0 }
 0x3e9   :  { %v749_v3 = vpop.f32.mrb[10].mxu0 }
 0x3ea   :  { %752 = vst [vmem:[#allocation14] sm:$0xff] %v747_v1  ;;  %v918_v4 = vpop.f32.mrb[11].mxu0 }
 0x3eb   :  { %1120 = shalt.err (!%p1117_p4)
}
 0x3ec   :  { %s1121_s11 = scalar_lea.hbm %s1413_s12, 128 }
 0x3ed   :  { %p1122_p5 = scmp.ne.s32.totalorder %s1413_s12, %s1121_s11  ;;  %p1125_p6 = scmp.lt.u32.totalorder %s1121_s11, %s1413_s12 }
 0x3ef   :  { %p1127_p7 = pnand %p1125_p6, %p1122_p5 }
 0x3f1   :  { %1130 = shalt.err (!%p1127_p7)
}
 0x3f2   :  { %762 = dma.vmem_to_hbm [thread:$0]  %s760_s30, 128, %s1413_s12, [#allocation4]  }
 0x3f3   :  { %1139 = dma.done.wait [#allocation4], 128  }
 0x3f4   :  { %1140 = vsyncadd [#allocation4], 4294967168 }
 0x3f5   :  { %766 = vsyncpa [#allocation3], 1 }
 0x3f6   :  { %767 = vsyncpa [#allocation6], 1 }
 0x3f7   :  { %768 = vsyncpa [#allocation9], 1 }
 0x3f8   :  { %769 = vsyncpa [#allocation12], 1 }
 0x3f9   :  { %770 = vsyncpa [#allocation4], 1 }

</bundles_post_ra>
